<compile_context>
chip_gen: v7x
topology: tpu7x:2x2x1
jax: 0.10.0
libtpu: 0.0.40
codegen_flags: <defaults>
</compile_context>

<pallas_src>
import jax
import jax.numpy as jnp
from jax.experimental import pallas as pl
from jax.experimental.pallas import tpu as pltpu

LANES = 128
TM_MAX = 8192                    # rows per block -> 4 MiB (f32) per input per buffer
VMEM_LIMIT = 32 * 1024 * 1024    # 3 inputs x 2 buffers x 4 MiB + headroom, all gens


def _round_up(x, m):
    return ((x + m - 1) // m) * m


def _num_tensorcores():
    """Best-effort TensorCores per chip: 2 on dual-TC/megacore chips, else 1."""
    try:
        dev = jax.devices()[0]
        if dev.platform != "tpu":
            return 1
        kind = str(getattr(dev, "device_kind", "")).lower()
    except Exception:
        return 1
    if "lite" in kind or "v5e" in kind or "v6e" in kind or "v6" in kind:
        return 1
    if "v4" in kind or "v5p" in kind or "v7" in kind:
        return 2
    return 1


def _make_kernel(n_in, tm, sub, rows, needs_mask):
    """Sum-of-squares over (tm, 128) blocks of a (rows, 128) slab.

    n_in == 3: inputs are (output, gt, r); computes ((o - gt) * r) ** 2.
    n_in == 1: input is the pre-fused error map p; computes p ** 2.
    """
    n_sub = tm // sub

    def _block_partial(in_refs, base_row, masked):
        # Stream the block in (sub, 128) row chunks so no (tm, 128)
        # intermediate is materialized; accumulate into one (8, 128) vreg.
        def body(k, acc):
            r0 = pl.multiple_of(k * sub, sub)
            x = in_refs[0][pl.ds(r0, sub), :].astype(jnp.float32)
            if n_in == 3:
                g = in_refs[1][pl.ds(r0, sub), :].astype(jnp.float32)
                w = in_refs[2][pl.ds(r0, sub), :].astype(jnp.float32)
                x = (x - g) * w
            sq = x * x                      # |x|^2 == x*x for real floats
            if masked:
                row_ids = (base_row + k * sub
                           + jax.lax.broadcasted_iota(jnp.int32, (sub, LANES), 0))
                # select (NOT multiply-by-mask) so NaN/Inf garbage in the
                # overhang rows cannot propagate into the accumulator.
                sq = jnp.where(row_ids < rows, sq, 0.0)
            return acc + jnp.sum(sq.reshape(sub // 8, 8, LANES), axis=0)

        return jax.lax.fori_loop(0, n_sub, body,
                                 jnp.zeros((8, LANES), jnp.float32))

    def kernel(*refs):
        in_refs = refs[:n_in]
        acc_ref = refs[n_in]

        @pl.when(pl.program_id(1) == 0)
        def _():
            acc_ref[...] = jnp.zeros_like(acc_ref)

        raw_t = pl.program_id(0) * pl.num_programs(1) + pl.program_id(1)
        base_row = raw_t * tm

        if needs_mask:
            # Only blocks that actually overhang `rows` (ragged last tile or a
            # clamped duplicate tile) pay the masking cost.
            overhang = base_row + tm > rows

            @pl.when(jnp.logical_not(overhang))
            def _():
                acc_ref[...] += _block_partial(in_refs, base_row, False)

            @pl.when(overhang)
            def _():
                acc_ref[...] += _block_partial(in_refs, base_row, True)
        else:
            acc_ref[...] += _block_partial(in_refs, base_row, False)

    return kernel


def _sum_sq_pallas(arrays, rows):
    """Sum of squared (fused) values over (rows, 128)-shaped inputs."""
    n_in = len(arrays)
    ncores = _num_tensorcores()

    tm = min(TM_MAX, _round_up(rows, 8))            # sublane-aligned block height
    sub = next(s for s in (64, 32, 16, 8) if tm % s == 0)
    n_tiles = pl.cdiv(rows, tm)
    n_j = pl.cdiv(n_tiles, ncores)
    has_dup = ncores * n_j != n_tiles               # clamped duplicate tiles exist
    needs_mask = has_dup or (rows % tm != 0)

    kernel = _make_kernel(n_in, tm, sub, rows, needs_mask)

    def in_map(c, j):
        t = c * n_j + j
        if has_dup:
            t = jnp.minimum(t, n_tiles - 1)         # keep duplicate DMA in-bounds
        return (t, 0)

    in_spec = pl.BlockSpec((tm, LANES), in_map)

    partials = pl.pallas_call(
        kernel,
        out_shape=jax.ShapeDtypeStruct((ncores * 8, LANES), jnp.float32),
        grid_spec=pltpu.PrefetchScalarGridSpec(
            num_scalar_prefetch=0,
            grid=(ncores, n_j),
            in_specs=[in_spec] * n_in,
            out_specs=pl.BlockSpec((8, LANES), lambda c, j: (c, 0)),
        ),
        compiler_params=pltpu.CompilerParams(
            dimension_semantics=("parallel", "arbitrary"),
            vmem_limit_bytes=VMEM_LIMIT,
        ),
    )(*arrays)

    # Cheap cross-lane collapse of the small per-core partials in JAX glue.
    return jnp.sum(partials)


@jax.jit
def errormap_loss(output, gt, r):
    """Pallas TPU implementation of mean(|(output - gt) * r| ** 2)."""
    assert output.shape == gt.shape == r.shape
    n_true = output.size
    rem = n_true % LANES

    if rem == 0:
        # Zero-copy: contiguous reshape is a bitcast; the kernel fuses the
        # whole elementwise chain and reads exactly N elements per input.
        rows = n_true // LANES
        arrays = [x.reshape(rows, LANES) for x in (output, gt, r)]
    else:
        # Misaligned numel: fuse (o - gt) * r and the <=1023-element zero pad
        # into one XLA pass (read 3N, write ~N); the kernel then only has to
        # square+reduce a single lane-aligned array (~read N).
        # TODO(synk): a fully zero-copy ragged path needs 1-D blocks plus an
        # in-kernel 1-D->2-D relayout, which Mosaic does not handle well.
        p = ((output.reshape(-1).astype(jnp.float32)
              - gt.reshape(-1).astype(jnp.float32))
             * r.reshape(-1).astype(jnp.float32))
        total = _round_up(n_true, 8 * LANES)
        p = jnp.pad(p, (0, total - n_true))         # zeros: 0**2 contributes 0
        rows = total // LANES
        arrays = [p.reshape(rows, LANES)]

    return _sum_sq_pallas(arrays, rows) / jnp.float32(n_true)


if __name__ == "__main__":
    key = jax.random.PRNGKey(0)
    k1, k2, k3 = jax.random.split(key, 3)

    # Case 1: lane-aligned numel -> zero-copy 3-input kernel path.
    shape = (2, 4, 16, 16)
    output = jax.random.normal(k1, shape, dtype=jnp.float32)
    gt = jax.random.normal(k2, shape, dtype=jnp.float32)
    r = jax.random.uniform(k3, shape, dtype=jnp.float32)
    loss = jax.block_until_ready(errormap_loss(output, gt, r))
    ref = jnp.mean(jnp.abs((output - gt) * r) ** 2)
    assert jnp.allclose(loss, ref, rtol=1e-5, atol=1e-6), (loss, ref)

    # Case 2: numel not a multiple of 128 -> fused-glue + 1-input kernel path.
    shape2 = (2, 3, 37, 53)
    o2 = jax.random.normal(k1, shape2, dtype=jnp.float32)
    g2 = jax.random.normal(k2, shape2, dtype=jnp.float32)
    r2 = jax.random.uniform(k3, shape2, dtype=jnp.float32)
    loss2 = jax.block_until_ready(errormap_loss(o2, g2, r2))
    ref2 = jnp.mean(jnp.abs((o2 - g2) * r2) ** 2)
    assert jnp.allclose(loss2, ref2, rtol=1e-5, atol=1e-6), (loss2, ref2)

    # Case 3: aligned numel but rows (21) not a multiple of the block height
    # -> exercises the pl.when-gated ragged-row mask in the 3-input kernel.
    shape3 = (2, 4, 16, 21)          # 2688 = 21 * 128 elements
    o3 = jax.random.normal(k1, shape3, dtype=jnp.float32)
    g3 = jax.random.normal(k2, shape3, dtype=jnp.float32)
    r3 = jax.random.uniform(k3, shape3, dtype=jnp.float32)
    loss3 = jax.block_until_ready(errormap_loss(o3, g3, r3))
    ref3 = jnp.mean(jnp.abs((o3 - g3) * r3) ** 2)
    assert jnp.allclose(loss3, ref3, rtol=1e-5, atol=1e-6), (loss3, ref3)

    print("KERNEL_OK")
</pallas_src>

<mosaic_0001>
module attributes {stable_mosaic.version = 11 : i64} {
  func.func @kernel(%arg0: i32, %arg1: i32, %arg2: memref<16x128xf32, #tpu.memory_space<vmem>>, %arg3: memref<16x128xf32, #tpu.memory_space<vmem>>, %arg4: memref<16x128xf32, #tpu.memory_space<vmem>>, %arg5: memref<8x128xf32, #tpu.memory_space<vmem>>) attributes {dimension_semantics = [#tpu.dimension_semantics<parallel>, #tpu.dimension_semantics<arbitrary>], iteration_bounds = array<i64: 1, 1>, scalar_prefetch = 0 : i64, scratch_operands = 0 : i64, tpu.core_type = #tpu.core_type<tc>, window_params = [{transform_indices = @transform_0, window_bounds = array<i64: 16, 128>}, {transform_indices = @transform_1, window_bounds = array<i64: 16, 128>}, {transform_indices = @transform_2, window_bounds = array<i64: 16, 128>}, {transform_indices = @transform_3, window_bounds = array<i64: 8, 128>}]} {
    %c0_i32 = arith.constant 0 : i32
    %0 = arith.cmpi eq, %arg1, %c0_i32 : i32
    %1 = arith.extui %0 : i1 to i32
    %c0_i32_0 = arith.constant 0 : i32
    %2 = arith.cmpi ne, %1, %c0_i32_0 : i32
    scf.if %2 {
      %cst_9 = arith.constant 0.000000e+00 : f32
      %21 = vector.broadcast %cst_9 : f32 to vector<8x128xf32>
      %c0_10 = arith.constant 0 : index
      %c0_11 = arith.constant 0 : index
      %22 = vector.load %arg5[%c0_10, %c0_11] : memref<8x128xf32, #tpu.memory_space<vmem>>, vector<8x128xf32>
      tpu.vector_store %arg5[%c0_10, %c0_11], %21 {strides = array<i32>} : memref<8x128xf32, #tpu.memory_space<vmem>>, vector<8x128xf32>,
    } else {
    }
    %c0 = arith.constant 0 : index
    %c0_1 = arith.constant 0 : index
    %3 = vector.load %arg5[%c0, %c0_1] : memref<8x128xf32, #tpu.memory_space<vmem>>, vector<8x128xf32>
    %cst = arith.constant 0.000000e+00 : f32
    %4 = vector.broadcast %cst : f32 to vector<8x128xf32>
    %c0_i32_2 = arith.constant 0 : i32
    %c16_i32 = arith.constant 16 : i32
    %5 = arith.muli %c0_i32_2, %c16_i32 : i32
    %6 = tpu.assume_multiple %5, 16 : i32
    %7 = arith.index_cast %6 : i32 to index
    %c0_3 = arith.constant 0 : index
    %8 = vector.load %arg2[%7, %c0_3] : memref<16x128xf32, #tpu.memory_space<vmem>>, vector<16x128xf32>
    %9 = arith.index_cast %6 : i32 to index
    %c0_4 = arith.constant 0 : index
    %10 = vector.load %arg3[%9, %c0_4] : memref<16x128xf32, #tpu.memory_space<vmem>>, vector<16x128xf32>
    %11 = arith.index_cast %6 : i32 to index
    %c0_5 = arith.constant 0 : index
    %12 = vector.load %arg4[%11, %c0_5] : memref<16x128xf32, #tpu.memory_space<vmem>>, vector<16x128xf32>
    %13 = arith.subf %8, %10 : vector<16x128xf32>
    %14 = arith.mulf %13, %12 : vector<16x128xf32>
    %15 = arith.mulf %14, %14 : vector<16x128xf32>
    %16 = vector.shape_cast %15 : vector<16x128xf32> to vector<2x8x128xf32>
    %cst_6 = arith.constant dense<0.000000e+00> : vector<8x128xf32>
    %17 = vector.multi_reduction <add>, %16, %cst_6 [0] : vector<2x8x128xf32> to vector<8x128xf32>
    %18 = arith.addf %4, %17 : vector<8x128xf32>
    %c1_i32 = arith.constant 1 : i32
    %19 = arith.addf %3, %18 : vector<8x128xf32>
    %c0_7 = arith.constant 0 : index
    %c0_8 = arith.constant 0 : index
    %20 = vector.load %arg5[%c0_7, %c0_8] : memref<8x128xf32, #tpu.memory_space<vmem>>, vector<8x128xf32>
    tpu.vector_store %arg5[%c0_7, %c0_8], %19 {strides = array<i32>} : memref<8x128xf32, #tpu.memory_space<vmem>>, vector<8x128xf32>,
    return
  }
  func.func @transform_0(%arg0: i32, %arg1: i32) -> (i32, i32) {
    %c1_i32 = arith.constant 1 : i32
    %0 = arith.muli %arg0, %c1_i32 : i32
    %1 = arith.addi %0, %arg1 : i32
    %c0_i32 = arith.constant 0 : i32
    %c0_i32_0 = arith.constant 0 : i32
    return %1, %c0_i32 : i32, i32
  }
  func.func @transform_1(%arg0: i32, %arg1: i32) -> (i32, i32) {
    %c1_i32 = arith.constant 1 : i32
    %0 = arith.muli %arg0, %c1_i32 : i32
    %1 = arith.addi %0, %arg1 : i32
    %c0_i32 = arith.constant 0 : i32
    %c0_i32_0 = arith.constant 0 : i32
    return %1, %c0_i32 : i32, i32
  }
  func.func @transform_2(%arg0: i32, %arg1: i32) -> (i32, i32) {
    %c1_i32 = arith.constant 1 : i32
    %0 = arith.muli %arg0, %c1_i32 : i32
    %1 = arith.addi %0, %arg1 : i32
    %c0_i32 = arith.constant 0 : i32
    %c0_i32_0 = arith.constant 0 : i32
    return %1, %c0_i32 : i32, i32
  }
  func.func @transform_3(%arg0: i32, %arg1: i32) -> (i32, i32) {
    %c0_i32 = arith.constant 0 : i32
    %c0_i32_0 = arith.constant 0 : i32
    return %arg0, %c0_i32 : i32, i32
  }
}

</mosaic_0001>

<bundles_post_ra>
// kernel: errormap_loss.1
= control target key start
LH: loop header
LB: loop body
LE: loop exit
PB: predicated region body
PF: predicated region fallthrough
CT: control target
= control target key end

     0   :  { %s166_s0 = inlined_call_operand.vmem [shape: f32[16,128], index: 0, kind: input, shape index: {}]   ;;  %s167_s1 = inlined_call_operand.vmem [shape: f32[16,128], index: 1, kind: input, shape index: {}]   ;;  %s168_s2 = inlined_call_operand.vmem [shape: f32[16,128], index: 2, kind: input, shape index: {}]   ;;  %s169_s3 = inlined_call_operand.vmem [shape: f32[8,128], index: 3, kind: output, shape index: {}]  }
   0x1   :  { %v86_v0 = vld [vmem:[%s166_s0] sm:$0xff]  ;;  %v87_v1 = vld [vmem:[%s166_s0 + $0x8] sm:$0xff] }
   0x2   :  { %v88_v2 = vld [vmem:[%s167_s1] sm:$0xff]  ;;  %v89_v3 = vld [vmem:[%s167_s1 + $0x8] sm:$0xff] }
   0x3   :  { %v90_v4 = vld [vmem:[%s168_s2] sm:$0xff]  ;;  %v91_v5 = vld [vmem:[%s168_s2 + $0x8] sm:$0xff]  ;;  %v92_v6 = vsub.f32 %v86_v0, %v88_v2  ;;  %v93_v7 = vsub.f32 %v87_v1, %v89_v3 }
   0x5   :  { %v94_v8 = vmul.f32 %v92_v6, %v90_v4  ;;  %v95_v9 = vmul.f32 %v93_v7, %v91_v5 }
   0x7   :  { %v96_v10 = vmul.f32 %v94_v8, %v94_v8  ;;  %v97_v11 = vmul.f32 %v95_v9, %v95_v9 }
   0x9   :  { %v98_v12 = vadd.f32 %v97_v11, %v96_v10 }
   0xb   :  { %101 = vst [vmem:[%s169_s3] sm:$0xff] %v98_v12 }

</bundles_post_ra>
